<compile_context>
chip_gen: v7x
topology: tpu7x:2x2x1
jax: 0.10.0
libtpu: 0.0.40
codegen_flags: <defaults>
</compile_context>

<pallas_src>
import functools

import jax
import jax.numpy as jnp
from jax import lax
from jax.experimental import pallas as pl
from jax.experimental.pallas import tpu as pltpu


def mlp_kernel(x_ref, w1_ref, b1_ref, w2_ref, b2_ref, w3_ref, b3_ref, oT_ref,
               *, compute_dtype):
    # x tile in natural (tb, obs) layout; weights in PyTorch (out, in) layout;
    # biases are (out, 1) columns that broadcast along the lane (batch) axis.
    x = x_ref[...].astype(compute_dtype)                       # (tb, obs)
    w1 = w1_ref[...].astype(compute_dtype)                     # (hid, obs)

    # h1^T = w1 @ x^T, expressed as a contraction over the shared `obs` axis so
    # x^T is never materialized in HBM (any transpose happens on the XLU).
    h1 = lax.dot_general(w1, x, (((1,), (1,)), ((), ())),
                         preferred_element_type=jnp.float32) + b1_ref[...]
    h1 = jnp.clip(h1, 0.0, 6.0)                                # ReLU6, f32 (hid, tb)

    h2 = jnp.dot(w2_ref[...].astype(compute_dtype), h1.astype(compute_dtype),
                 preferred_element_type=jnp.float32) + b2_ref[...]
    h2 = jnp.clip(h2, 0.0, 6.0)                                # ReLU6, f32 (hid, tb)

    oT_ref[...] = (jnp.dot(w3_ref[...].astype(compute_dtype),
                           h2.astype(compute_dtype),
                           preferred_element_type=jnp.float32)
                   + b3_ref[...]).astype(oT_ref.dtype)         # (act, tb)


# Largest lane-axis batch tile we pick by default.  At tb=8192 the VMEM
# footprint (x/out pipeline buffers + the (64, tb) f32 and bf16 intermediates)
# is ~7-8 MiB, comfortably inside v5e's 16 MiB default scoped VMEM and far
# below v7x's 64 MiB physical VMEM.  Sweep `batch_tile` upward explicitly
# (with vmem_limit_bytes) if you want to go bigger on v6e/v7x.
_MAX_BATCH_TILE = 8192


def _default_batch_tile(B: int) -> int:
    """Lane-axis batch tile.

    When B is a multiple of 256, pick the largest multiple of 128 (capped at
    _MAX_BATCH_TILE) that divides B and yields an EVEN grid of >= 2 steps, so
    v7x's two TensorCores split the work evenly.  Otherwise fall back to the
    full batch (a legal full-extent block; single grid step).
    """
    if B % 256 == 0:
        for cand in (_MAX_BATCH_TILE, 4096, 2048, 1024, 512, 256, 128):
            if cand * 2 <= B and B % cand == 0 and (B // cand) % 2 == 0:
                return cand
    return B


def dqn_network_forward(x, params, *, batch_tile=None,
                        compute_dtype=jnp.bfloat16,
                        return_transposed=False):
    """Forward pass of Network(action_dim, observ_dim) as one Pallas kernel.

    x:      (B, observ_dim) float32
    params: w1 (64, obs), b1 (64, 1), w2 (64, 64), b2 (64, 1),
            w3 (act, 64),  b3 (act, 1)   -- PyTorch (out, in) weight layout.
    compute_dtype: MXU operand dtype (accumulation is always f32).  Default
            bf16; pass jnp.float32 for a bit-faithful reference mode.
    return_transposed: if True, return the kernel's native (action_dim, B)
            layout (skips the final XLA transpose; handy for latency-bound
            acting paths whose consumer is an argmax over actions).
    """
    if compute_dtype is None:
        compute_dtype = jnp.float32

    B, obs_dim = x.shape
    hid = params["w1"].shape[0]
    act_dim = params["w3"].shape[0]

    tb = _default_batch_tile(B) if batch_tile is None else batch_tile
    assert B % tb == 0, "batch must be divisible by batch_tile"
    assert tb == B or tb % 128 == 0, \
        "lane-axis batch tile must be the full batch or a multiple of 128"

    grid = (B // tb,)

    def resident(shape):
        # Block index never changes -> operand stays VMEM-resident across steps.
        return pl.BlockSpec(shape, lambda i: (0,) * len(shape))

    flops = 2 * B * (obs_dim * hid + hid * hid + hid * act_dim)
    bytes_accessed = 4 * (B * (obs_dim + act_dim)                 # x in, out (f32)
                          + hid * (obs_dim + hid + act_dim)       # weights (f32)
                          + 2 * hid + act_dim)                    # biases

    outT = pl.pallas_call(
        functools.partial(mlp_kernel, compute_dtype=compute_dtype),
        out_shape=jax.ShapeDtypeStruct((act_dim, B), jnp.float32),
        grid_spec=pltpu.PrefetchScalarGridSpec(
            num_scalar_prefetch=0,
            grid=grid,
            in_specs=[
                pl.BlockSpec((tb, obs_dim), lambda i: (i, 0)),   # x, natural layout
                resident((hid, obs_dim)),                        # w1
                resident((hid, 1)),                              # b1 (column)
                resident((hid, hid)),                            # w2
                resident((hid, 1)),                              # b2
                resident((act_dim, hid)),                        # w3
                resident((act_dim, 1)),                          # b3
            ],
            out_specs=pl.BlockSpec((act_dim, tb), lambda i: (0, i)),
        ),
        compiler_params=pltpu.CompilerParams(
            dimension_semantics=("parallel",)),
        cost_estimate=pl.CostEstimate(
            flops=flops, transcendentals=0, bytes_accessed=bytes_accessed),
    )(x, params["w1"], params["b1"], params["w2"], params["b2"],
      params["w3"], params["b3"])

    return outT if return_transposed else outT.T                 # (B, act_dim)


def init_params(key, observ_dim, action_dim, hidden=64):
    """Matches the PyTorch module's init: Linear weights xavier_uniform_,
    biases normal(mean=0, std=0.01). Weights stored as (out, in)."""
    ks = jax.random.split(key, 6)

    def xavier_uniform(k, fan_out, fan_in):
        bound = jnp.sqrt(6.0 / (fan_in + fan_out))
        return jax.random.uniform(k, (fan_out, fan_in), jnp.float32, -bound, bound)

    return {
        "w1": xavier_uniform(ks[0], hidden, observ_dim),
        "b1": 0.01 * jax.random.normal(ks[1], (hidden, 1), jnp.float32),
        "w2": xavier_uniform(ks[2], hidden, hidden),
        "b2": 0.01 * jax.random.normal(ks[3], (hidden, 1), jnp.float32),
        "w3": xavier_uniform(ks[4], action_dim, hidden),
        "b3": 0.01 * jax.random.normal(ks[5], (action_dim, 1), jnp.float32),
    }


def reference_forward(x, p):
    relu6 = lambda v: jnp.clip(v, 0.0, 6.0)
    h1 = relu6(x @ p["w1"].T + p["b1"].T)
    h2 = relu6(h1 @ p["w2"].T + p["b2"].T)
    return h2 @ p["w3"].T + p["b3"].T


if __name__ == "__main__":
    observ_dim = 16
    action_dim = 4

    key = jax.random.PRNGKey(0)
    k_params, k_x1, k_x2 = jax.random.split(key, 3)
    params = init_params(k_params, observ_dim, action_dim)

    # --- Small acting-path shape (single full-batch tile, single grid step) ---
    batch = 8
    x = jax.random.normal(k_x1, (batch, observ_dim), jnp.float32)
    ref = reference_forward(x, params)

    # f32 reference mode: bit-accurate path, tight tolerance.
    out_f32 = jax.block_until_ready(
        dqn_network_forward(x, params, compute_dtype=jnp.float32))
    assert out_f32.shape == (batch, action_dim)
    assert jnp.allclose(out_f32, ref, atol=1e-5, rtol=1e-5)

    # Default bf16 operands (f32 accumulation): expected bf16-level mismatch.
    out_bf16 = jax.block_until_ready(dqn_network_forward(x, params))
    assert out_bf16.shape == (batch, action_dim)
    assert jnp.allclose(out_bf16, ref, atol=5e-2, rtol=5e-2)

    # Transposed-output fast path (skips the final XLA transpose).
    outT = jax.block_until_ready(
        dqn_network_forward(x, params, return_transposed=True))
    assert outT.shape == (action_dim, batch)
    assert jnp.allclose(outT.T, ref, atol=5e-2, rtol=5e-2)

    # --- Training-sized batch: lane-dense 128-row tiles, even 2-step grid ----
    batch_big = 256
    xb = jax.random.normal(k_x2, (batch_big, observ_dim), jnp.float32)
    ref_b = reference_forward(xb, params)

    out_b = jax.block_until_ready(dqn_network_forward(xb, params))
    assert out_b.shape == (batch_big, action_dim)
    assert jnp.allclose(out_b, ref_b, atol=5e-2, rtol=5e-2)

    out_b_f32 = jax.block_until_ready(
        dqn_network_forward(xb, params, compute_dtype=jnp.float32))
    assert jnp.allclose(out_b_f32, ref_b, atol=1e-4, rtol=1e-4)

    print("KERNEL_OK")
</pallas_src>

<mosaic_0001>
module attributes {stable_mosaic.version = 11 : i64} {
  func.func @mlp_kernel(%arg0: i32, %arg1: memref<8x16xf32, #tpu.memory_space<vmem>>, %arg2: memref<64x16xf32, #tpu.memory_space<vmem>>, %arg3: memref<64x1xf32, #tpu.memory_space<vmem>>, %arg4: memref<64x64xf32, #tpu.memory_space<vmem>>, %arg5: memref<64x1xf32, #tpu.memory_space<vmem>>, %arg6: memref<4x64xf32, #tpu.memory_space<vmem>>, %arg7: memref<4x1xf32, #tpu.memory_space<vmem>>, %arg8: memref<4x8xf32, #tpu.memory_space<vmem>>) attributes {dimension_semantics = [#tpu.dimension_semantics<parallel>], iteration_bounds = array<i64: 1>, scalar_prefetch = 0 : i64, scratch_operands = 0 : i64, tpu.core_type = #tpu.core_type<tc>, window_params = [{transform_indices = @transform_0, window_bounds = array<i64: 8, 16>}, {pipeline_mode = #tpu.pipeline_mode<synchronous>, transform_indices = @transform_1, window_bounds = array<i64: 64, 16>}, {pipeline_mode = #tpu.pipeline_mode<synchronous>, transform_indices = @transform_2, window_bounds = array<i64: 64, 1>}, {pipeline_mode = #tpu.pipeline_mode<synchronous>, transform_indices = @transform_3, window_bounds = array<i64: 64, 64>}, {pipeline_mode = #tpu.pipeline_mode<synchronous>, transform_indices = @transform_4, window_bounds = array<i64: 64, 1>}, {pipeline_mode = #tpu.pipeline_mode<synchronous>, transform_indices = @transform_5, window_bounds = array<i64: 4, 64>}, {pipeline_mode = #tpu.pipeline_mode<synchronous>, transform_indices = @transform_6, window_bounds = array<i64: 4, 1>}, {transform_indices = @transform_7, window_bounds = array<i64: 4, 8>}]} {
    %c0 = arith.constant 0 : index
    %c0_0 = arith.constant 0 : index
    %0 = vector.load %arg1[%c0, %c0_0] : memref<8x16xf32, #tpu.memory_space<vmem>>, vector<8x16xf32>
    %c0_1 = arith.constant 0 : index
    %c0_2 = arith.constant 0 : index
    %1 = vector.load %arg2[%c0_1, %c0_2] : memref<64x16xf32, #tpu.memory_space<vmem>>, vector<64x16xf32>
    %cst = arith.constant dense<0.000000e+00> : vector<64x8xf32>
    %2 = tpu.matmul %1, %0, %cst {dimension_numbers = #tpu.dot_dimension_numbers<[1], [1], [0], [0], [0, 0, 1, 0], [], []>} : vector<64x16xf32>, vector<8x16xf32>, vector<64x8xf32> -> vector<64x8xf32>
    %c0_3 = arith.constant 0 : index
    %c0_4 = arith.constant 0 : index
    %3 = vector.load %arg3[%c0_3, %c0_4] : memref<64x1xf32, #tpu.memory_space<vmem>>, vector<64x1xf32>
    %4 = vector.broadcast %3 : vector<64x1xf32> to vector<64x8xf32>
    %5 = arith.addf %2, %4 : vector<64x8xf32>
    %cst_5 = arith.constant 0.000000e+00 : f32
    %cst_6 = arith.constant 6.000000e+00 : f32
    %6 = vector.broadcast %cst_5 : f32 to vector<64x8xf32>
    %7 = arith.maximumf %6, %5 : vector<64x8xf32>
    %8 = vector.broadcast %cst_6 : f32 to vector<64x8xf32>
    %9 = arith.minimumf %8, %7 : vector<64x8xf32>
    %c0_7 = arith.constant 0 : index
    %c0_8 = arith.constant 0 : index
    %10 = vector.load %arg4[%c0_7, %c0_8] : memref<64x64xf32, #tpu.memory_space<vmem>>, vector<64x64xf32>
    %cst_9 = arith.constant dense<0.000000e+00> : vector<64x8xf32>
    %11 = tpu.matmul %10, %9, %cst_9 {dimension_numbers = #tpu.dot_dimension_numbers<[1], [0], [0], [1], [0, 0, 1, 1], [], []>} : vector<64x64xf32>, vector<64x8xf32>, vector<64x8xf32> -> vector<64x8xf32>
    %c0_10 = arith.constant 0 : index
    %c0_11 = arith.constant 0 : index
    %12 = vector.load %arg5[%c0_10, %c0_11] : memref<64x1xf32, #tpu.memory_space<vmem>>, vector<64x1xf32>
    %13 = vector.broadcast %12 : vector<64x1xf32> to vector<64x8xf32>
    %14 = arith.addf %11, %13 : vector<64x8xf32>
    %cst_12 = arith.constant 0.000000e+00 : f32
    %cst_13 = arith.constant 6.000000e+00 : f32
    %15 = vector.broadcast %cst_12 : f32 to vector<64x8xf32>
    %16 = arith.maximumf %15, %14 : vector<64x8xf32>
    %17 = vector.broadcast %cst_13 : f32 to vector<64x8xf32>
    %18 = arith.minimumf %17, %16 : vector<64x8xf32>
    %c0_14 = arith.constant 0 : index
    %c0_15 = arith.constant 0 : index
    %19 = vector.load %arg6[%c0_14, %c0_15] : memref<4x64xf32, #tpu.memory_space<vmem>>, vector<4x64xf32>
    %cst_16 = arith.constant dense<0.000000e+00> : vector<4x8xf32>
    %20 = tpu.matmul %19, %18, %cst_16 {dimension_numbers = #tpu.dot_dimension_numbers<[1], [0], [0], [1], [0, 0, 1, 1], [], []>} : vector<4x64xf32>, vector<64x8xf32>, vector<4x8xf32> -> vector<4x8xf32>
    %c0_17 = arith.constant 0 : index
    %c0_18 = arith.constant 0 : index
    %21 = vector.load %arg7[%c0_17, %c0_18] : memref<4x1xf32, #tpu.memory_space<vmem>>, vector<4x1xf32>
    %22 = vector.broadcast %21 : vector<4x1xf32> to vector<4x8xf32>
    %23 = arith.addf %20, %22 : vector<4x8xf32>
    %c0_19 = arith.constant 0 : index
    %c0_20 = arith.constant 0 : index
    %24 = vector.load %arg8[%c0_19, %c0_20] : memref<4x8xf32, #tpu.memory_space<vmem>>, vector<4x8xf32>
    tpu.vector_store %arg8[%c0_19, %c0_20], %23 {strides = array<i32>} : memref<4x8xf32, #tpu.memory_space<vmem>>, vector<4x8xf32>,
    return
  }
  func.func @transform_0(%arg0: i32) -> (i32, i32) {
    %c0_i32 = arith.constant 0 : i32
    %c0_i32_0 = arith.constant 0 : i32
    return %arg0, %c0_i32 : i32, i32
  }
  func.func @transform_1(%arg0: i32) -> (i32, i32) {
    %c0_i32 = arith.constant 0 : i32
    %c0_i32_0 = arith.constant 0 : i32
    %c0_i32_1 = arith.constant 0 : i32
    return %c0_i32, %c0_i32_0 : i32, i32
  }
  func.func @transform_2(%arg0: i32) -> (i32, i32) {
    %c0_i32 = arith.constant 0 : i32
    %c0_i32_0 = arith.constant 0 : i32
    %c0_i32_1 = arith.constant 0 : i32
    return %c0_i32, %c0_i32_0 : i32, i32
  }
  func.func @transform_3(%arg0: i32) -> (i32, i32) {
    %c0_i32 = arith.constant 0 : i32
    %c0_i32_0 = arith.constant 0 : i32
    %c0_i32_1 = arith.constant 0 : i32
    return %c0_i32, %c0_i32_0 : i32, i32
  }
  func.func @transform_4(%arg0: i32) -> (i32, i32) {
    %c0_i32 = arith.constant 0 : i32
    %c0_i32_0 = arith.constant 0 : i32
    %c0_i32_1 = arith.constant 0 : i32
    return %c0_i32, %c0_i32_0 : i32, i32
  }
  func.func @transform_5(%arg0: i32) -> (i32, i32) {
    %c0_i32 = arith.constant 0 : i32
    %c0_i32_0 = arith.constant 0 : i32
    %c0_i32_1 = arith.constant 0 : i32
    return %c0_i32, %c0_i32_0 : i32, i32
  }
  func.func @transform_6(%arg0: i32) -> (i32, i32) {
    %c0_i32 = arith.constant 0 : i32
    %c0_i32_0 = arith.constant 0 : i32
    %c0_i32_1 = arith.constant 0 : i32
    return %c0_i32, %c0_i32_0 : i32, i32
  }
  func.func @transform_7(%arg0: i32) -> (i32, i32) {
    %c0_i32 = arith.constant 0 : i32
    %c0_i32_0 = arith.constant 0 : i32
    return %c0_i32, %arg0 : i32, i32
  }
}

</mosaic_0001>

<bundles_post_ra>
// kernel: tpu_custom_call.1
= control target key start
LH: loop header
LB: loop body
LE: loop exit
PB: predicated region body
PF: predicated region fallthrough
CT: control target
= control target key end

     0   :  { %vm84_vm0 = vcmask 130048   ;;  %v703_v3 = vmov 0   ;;  %s884_s0 = inlined_call_operand.vmem [shape: f32[8,16], index: 0, kind: input, shape index: {}]   ;;  %s885_s1 = inlined_call_operand.vmem [shape: f32[64,16], index: 1, kind: input, shape index: {}]   ;;  %s886_s2 = inlined_call_operand.vmem [shape: f32[64,1], index: 2, kind: input, shape index: {}]   ;;  %s887_s3 = inlined_call_operand.vmem [shape: f32[64,64], index: 3, kind: input, shape index: {}]   ;;  %s888_s4 = inlined_call_operand.vmem [shape: f32[64,1], index: 4, kind: input, shape index: {}]   ;;  %s889_s5 = inlined_call_operand.vmem [shape: f32[4,64], index: 5, kind: input, shape index: {}]   ;;  %s890_s6 = inlined_call_operand.vmem [shape: f32[4,1], index: 6, kind: input, shape index: {}]   ;;  %s891_s7 = inlined_call_operand.hbm [shape: f32[4,8], index: 7, kind: output, shape index: {}]  }
   0x1   :  { %v27_v0 = vld [vmem:[%s884_s0] sm:$0xff]  ;;  %v29_v2 = vld [vmem:[%s885_s1 + $0x8] sm:$0xff]  ;;  %677 = vset.pattern.permute.xlu0 %v703_v3  ;;  %v30_v4 = vld [vmem:[%s885_s1 + $0x10] sm:$0xff]  ;;  %678 = vset.pattern.permute.xlu1 %v703_v3 }
   0x2   :  { %v28_v1 = vld [vmem:[%s885_s1] sm:$0xff]  ;;  %583 = vmatprep.subr.msk.mxu0 %vm84_vm0, %v27_v0  ;;  %v38_v6 = vld [vmem:[%s886_s2 + $0x10] sm:$0xff]  ;;  %v37_v7 = vld [vmem:[%s886_s2 + $0x8] sm:$0xff] }
   0x3   :  { %585 = vmatprep.mubr.msk.f32.mxu0 %vm84_vm0, %v28_v1  ;;  %584 = vmatpush3.xpose.msk.msra.mxu0 %vm84_vm0, %v27_v0  ;;  %v36_v5 = vld [vmem:[%s886_s2] sm:$0xff]  ;;  %v39_v8 = vld [vmem:[%s886_s2 + $0x18] sm:$0xff] }
   0x4   :  { %46 = vperm.xlu0 %677, %v36_v5   ;;  %56 = vperm.xlu1 %678, %v38_v6   ;;  %v31_v9 = vld [vmem:[%s885_s1 + $0x18] sm:$0xff]  ;;  %v32_v10 = vld [vmem:[%s885_s1 + $0x20] sm:$0xff] }
   0x6   :  { %586 = vmatmul.mubr.msk.f32.vlgmr.msra.gmra.mrb[0].mxu0 %vm84_vm0, %v29_v2 }
   0x7   :  { %588 = vmatprep.mubr.msk.f32.mxu0 %vm84_vm0, %v30_v4 }
   0x8   :  { %51 = vperm.xlu0 %677, %v37_v7   ;;  %61 = vperm.xlu1 %678, %v39_v8  }
   0x9   :  { %12 = vsyncpa [#allocation3], 0  ;;  %v40_v11 = vld [vmem:[%s886_s2 + $0x20] sm:$0xff]  ;;  %v41_v12 = vld [vmem:[%s886_s2 + $0x28] sm:$0xff]  ;;  %vm289_vm1 = vcmask 523264   ;;  %vm705_vm2 = vmmov 0  }
   0xa   :  { %589 = vmatmul.mubr.msk.f32.gmra.mrb[2].mxu0 %vm84_vm0, %v31_v9  ;;  %v33_v13 = vld [vmem:[%s885_s1 + $0x28] sm:$0xff]  ;;  %v34_v14 = vld [vmem:[%s885_s1 + $0x30] sm:$0xff]  ;;  %v43_v16 = vld [vmem:[%s886_s2 + $0x38] sm:$0xff]  ;;  %vm515_vm3 = vcmask 60416  }
   0xb   :  { %591 = vmatprep.mubr.msk.f32.mxu0 %vm84_vm0, %v32_v10  ;;  %v42_v15 = vld [vmem:[%s886_s2 + $0x30] sm:$0xff]  ;;  %v35_v17 = vld [vmem:[%s885_s1 + $0x38] sm:$0xff]  ;;  %v241_v18 = vld [vmem:[%s888_s4] sm:$0xff]  ;;  %s707_s1 = smov [#allocation2]  }
   0xc   :  { %66 = vperm.xlu0 %677, %v40_v11   ;;  %71 = vperm.xlu1 %678, %v41_v12   ;;  %v242_v19 = vld [vmem:[%s888_s4 + $0x8] sm:$0xff]  ;;  %v243_v20 = vld [vmem:[%s888_s4 + $0x10] sm:$0xff]  ;;  %v244_v21 = vld [vmem:[%s888_s4 + $0x18] sm:$0xff]  ;;  %s523_s16 = sshll.u32 %s707_s1, 4  ;;  %s524_s16 = int_to_ptr.vmem [resolvable:$true] %s523_s16 }
   0xd   :  { %v245_v22 = vld [vmem:[%s888_s4 + $0x20] sm:$0xff]  ;;  %v246_v23 = vld [vmem:[%s888_s4 + $0x28] sm:$0xff]  ;;  %v247_v24 = vld [vmem:[%s888_s4 + $0x30] sm:$0xff]  ;;  %s679_s17 = scalar_lea.vmem %s524_s16, 64  ;;  %p684_p1 = scmp.lt.s32.totalorder %s524_s16, %s524_s16 }
   0xe   :  { %592 = vmatmul.mubr.msk.f32.gmra.mrb[4].mxu0 %vm84_vm0, %v33_v13  ;;  %v248_v25 = vld [vmem:[%s888_s4 + $0x38] sm:$0xff]  ;;  %v436_v26 = vld [vmem:[%s890_s6] sm:$0xf]  ;;  %v234_v8 = vld [vmem:[%s887_s3 + $0x8] sm:$0xff]  ;;  %p680_p0 = scmp.ne.s32.totalorder %s524_s16, %s679_s17  ;;  %p685_p2 = scmp.lt.s32.totalorder %s679_s17, %s679_s17 }
   0xf   :  { %594 = vmatprep.mubr.msk.f32.mxu0 %vm84_vm0, %v34_v14  ;;  %v233_v27 = vld [vmem:[%s887_s3] sm:$0xff]  ;;  %v235_v9 = vld [vmem:[%s887_s3 + $0x10] sm:$0xff]  ;;  %v236_v10 = vld [vmem:[%s887_s3 + $0x18] sm:$0xff] }
  0x10   :  { %76 = vperm.xlu0 %677, %v42_v15   ;;  %81 = vperm.xlu1 %678, %v43_v16   ;;  %v237_v11 = vld [vmem:[%s887_s3 + $0x20] sm:$0xff]  ;;  %v238_v12 = vld [vmem:[%s887_s3 + $0x28] sm:$0xff]  ;;  %v239_v13 = vld [vmem:[%s887_s3 + $0x30] sm:$0xff]  ;;  %v704_v15 = vmov 0.0|0.0   ;;  %v706_v16 = vmov 0.0   ;;  %p686_p3 = por %p685_p2, %p684_p1 }
  0x11   :  { %613 = vmatprep.mubr.msk.f32.mxu1 %vm289_vm1, %v233_v27  ;;  %v240_v14 = vld [vmem:[%s887_s3 + $0x38] sm:$0xff]  ;;  %660 = vmatprep.subr.bf16.mxu0 %v704_v15 }
  0x12   :  { %595 = vmatmul.mubr.msk.f32.gmra.mrb[6].mxu0 %vm84_vm0, %v35_v17  ;;  %p687_p4 = pnand %p686_p3, %p680_p0 }
  0x13   :  { %641 = vmatprep.mubr.msk.f32.mxu0 %vm705_vm2, %v706_v16 }
  0x14   :  { %251 = vperm.xlu0 %677, %v241_v18   ;;  %256 = vperm.xlu1 %678, %v242_v19  }
  0x18   :  { %261 = vperm.xlu0 %677, %v243_v20   ;;  %266 = vperm.xlu1 %678, %v244_v21  }
  0x1c   :  { %271 = vperm.xlu0 %677, %v245_v22   ;;  %276 = vperm.xlu1 %678, %v246_v23  }
  0x20   :  { %281 = vperm.xlu0 %677, %v247_v24   ;;  %286 = vperm.xlu1 %678, %v248_v25  }
  0x24   :  { %439 = vperm.xlu0 %677, %v436_v26  }
  0x83   :  { %v47_v28 = vpop.permute.xlu0 %46  ;;  %v57_v29 = vpop.permute.xlu1 %56 }
  0x87   :  { %v52_v30 = vpop.permute.xlu0 %51  ;;  %v62_v31 = vpop.permute.xlu1 %61 }
  0x8b   :  { %v72_v42 = vpop.permute.xlu1 %71  ;;  %v67_v45 = vpop.permute.xlu0 %66 }
  0x8f   :  { %v82_v56 = vpop.permute.xlu1 %81  ;;  %v77_v60 = vpop.permute.xlu0 %76 }
  0x93   :  { %v257_v17 = vpop.permute.xlu1 %256  ;;  %v252_v18 = vpop.permute.xlu0 %251 }
  0x97   :  { %v267_v19 = vpop.permute.xlu1 %266  ;;  %v262_v21 = vpop.permute.xlu0 %261 }
  0xd9   :  { %v587_v32 = vpop.f32.mrb[0].mxu0 }
  0xda   :  { %v184_v33 = vadd.f32 %v587_v32, %v52_v30  ;;  %v178_v34 = vpop.f32.mrb[1].mxu0 }
  0xdb   :  { %v179_v35 = vadd.f32 %v178_v34, %v47_v28  ;;  %v272_v34 = vpop.permute.xlu0 %271 }
  0xdc   :  { %v218_v36 = vmax.f32 %v184_v33, 0.0 }
  0xdd   :  { %v217_v37 = vmax.f32 %v179_v35, 0.0  ;;  %v590_v38 = vpop.f32.mrb[2].mxu0 }
  0xde   :  { %v226_v39 = vmin.f32 %v218_v36, 6.0  ;;  %v194_v40 = vadd.f32 %v590_v38, %v62_v31  ;;  %v188_v41 = vpop.f32.mrb[3].mxu0  ;;  %v277_v31 = vpop.permute.xlu1 %276 }
  0xdf   :  { %v225_v43 = vmin.f32 %v217_v37, 6.0  ;;  %v189_v44 = vadd.f32 %v188_v41, %v57_v29 }
  0xe0   :  { %v220_v46 = vmax.f32 %v194_v40, 0.0 }
  0xe1   :  { %v219_v47 = vmax.f32 %v189_v44, 0.0  ;;  %v593_v48 = vpop.f32.mrb[4].mxu0  ;;  %v644_v49 = vpack.c.bf16 %v226_v39, %v225_v43 }
  0xe2   :  { %v228_v50 = vmin.f32 %v220_v46, 6.0  ;;  %v204_v51 = vadd.f32 %v593_v48, %v72_v42  ;;  %v198_v52 = vpop.f32.mrb[5].mxu0 }
  0xe3   :  { %v227_v53 = vmin.f32 %v219_v47, 6.0  ;;  %v199_v54 = vadd.f32 %v198_v52, %v67_v45  ;;  %645 = vmatprep.subr.bf16.mxu1 %v644_v49  ;;  %v287_v45 = vpop.permute.xlu1 %286 }
  0xe4   :  { %v222_v55 = vmax.f32 %v204_v51, 0.0  ;;  %647 = vmatpush3.bf16.msra.mxu1 %v644_v49  ;;  %v282_v49 = vpop.permute.xlu0 %281 }
  0xe5   :  { %v648_v57 = vpack.c.bf16 %v228_v50, %v227_v53  ;;  %v221_v58 = vmax.f32 %v199_v54, 0.0  ;;  %v596_v59 = vpop.f32.mrb[6].mxu0 }
  0xe6   :  { %v230_v61 = vmin.f32 %v222_v55, 6.0  ;;  %v214_v62 = vadd.f32 %v596_v59, %v82_v56  ;;  %v208_v63 = vpop.f32.mrb[7].mxu0 }
  0xe7   :  { %v229_v0 = vmin.f32 %v221_v58, 6.0  ;;  %v209_v1 = vadd.f32 %v208_v63, %v77_v60  ;;  %649 = vmatprep.subr.bf16.mxu1 %v648_v57 }
  0xe8   :  { %v224_v2 = vmax.f32 %v214_v62, 0.0  ;;  %651 = vmatpush3.bf16.msra.mxu1 %v648_v57  ;;  %v440_v62 = vpop.permute.xlu0 %439 }
  0xe9   :  { %v652_v3 = vpack.c.bf16 %v230_v61, %v229_v0  ;;  %v223_v4 = vmax.f32 %v209_v1, 0.0  ;;  %v435_v61 = vld [vmem:[%s889_s5] sm:$0xf] }
  0xea   :  { %v232_v5 = vmin.f32 %v224_v2, 6.0 }
  0xeb   :  { %v231_v6 = vmin.f32 %v223_v4, 6.0  ;;  %653 = vmatprep.subr.bf16.mxu1 %v652_v3 }
  0xec   :  { %655 = vmatpush3.bf16.msra.mxu1 %v652_v3 }
  0xed   :  { %v656_v7 = vpack.c.bf16 %v232_v5, %v231_v6 }
  0xef   :  { %657 = vmatprep.subr.bf16.mxu1 %v656_v7 }
  0xf0   :  { %659 = vmatpush3.bf16.msra.mxu1 %v656_v7 }
  0xf3   :  { %614 = vmatmul.mubr.msk.f32.vlgmr.msra.gmra.mrb[0].mxu1 %vm289_vm1, %v234_v8 }
  0xf4   :  { %616 = vmatprep.mubr.msk.f32.mxu1 %vm289_vm1, %v235_v9 }
  0xf7   :  { %617 = vmatmul.mubr.msk.f32.gmra.mrb[2].mxu1 %vm289_vm1, %v236_v10 }
  0xf8   :  { %619 = vmatprep.mubr.msk.f32.mxu1 %vm289_vm1, %v237_v11 }
  0xfb   :  { %620 = vmatmul.mubr.msk.f32.gmra.mrb[4].mxu1 %vm289_vm1, %v238_v12 }
  0xfc   :  { %622 = vmatprep.mubr.msk.f32.mxu1 %vm289_vm1, %v239_v13 }
  0xff   :  { %623 = vmatmul.mubr.msk.f32.gmra.mrb[6].mxu1 %vm289_vm1, %v240_v14 }
 0x1c6   :  { %v615_v20 = vpop.f32.mrb[0].mxu1 }
 0x1c7   :  { %v386_v22 = vadd.f32 %v615_v20, %v257_v17  ;;  %v380_v23 = vpop.f32.mrb[1].mxu1 }
 0x1c8   :  { %v381_v24 = vadd.f32 %v380_v23, %v252_v18 }
 0x1c9   :  { %v420_v25 = vmax.f32 %v386_v22, 0.0 }
 0x1ca   :  { %v419_v26 = vmax.f32 %v381_v24, 0.0  ;;  %v618_v27 = vpop.f32.mrb[2].mxu1 }
 0x1cb   :  { %v428_v28 = vmin.f32 %v420_v25, 6.0  ;;  %v396_v29 = vadd.f32 %v618_v27, %v267_v19  ;;  %v390_v30 = vpop.f32.mrb[3].mxu1 }
 0x1cc   :  { %v427_v32 = vmin.f32 %v419_v26, 6.0  ;;  %v391_v33 = vadd.f32 %v390_v30, %v262_v21 }
 0x1cd   :  { %v422_v35 = vmax.f32 %v396_v29, 0.0 }
 0x1ce   :  { %v661_v36 = vpack.c.bf16 %v428_v28, %v427_v32  ;;  %v421_v37 = vmax.f32 %v391_v33, 0.0  ;;  %v621_v38 = vpop.f32.mrb[4].mxu1 }
 0x1cf   :  { %v430_v39 = vmin.f32 %v422_v35, 6.0  ;;  %v406_v40 = vadd.f32 %v621_v38, %v277_v31  ;;  %v400_v41 = vpop.f32.mrb[5].mxu1 }
 0x1d0   :  { %v429_v42 = vmin.f32 %v421_v37, 6.0  ;;  %v401_v43 = vadd.f32 %v400_v41, %v272_v34  ;;  %662 = vmatpush3.bf16.msra.mxu0 %v661_v36 }
 0x1d1   :  { %v424_v44 = vmax.f32 %v406_v40, 0.0  ;;  %663 = vmatprep.subr.bf16.mxu0 %v704_v15 }
 0x1d2   :  { %v664_v46 = vpack.c.bf16 %v430_v39, %v429_v42  ;;  %v423_v47 = vmax.f32 %v401_v43, 0.0  ;;  %v624_v48 = vpop.f32.mrb[6].mxu1 }
 0x1d3   :  { %v432_v50 = vmin.f32 %v424_v44, 6.0  ;;  %v416_v51 = vadd.f32 %v624_v48, %v287_v45  ;;  %v410_v52 = vpop.f32.mrb[7].mxu1 }
 0x1d4   :  { %v431_v53 = vmin.f32 %v423_v47, 6.0  ;;  %v411_v54 = vadd.f32 %v410_v52, %v282_v49  ;;  %665 = vmatpush3.bf16.msra.mxu0 %v664_v46 }
 0x1d5   :  { %v426_v55 = vmax.f32 %v416_v51, 0.0  ;;  %666 = vmatprep.subr.bf16.mxu0 %v704_v15 }
 0x1d6   :  { %v667_v56 = vpack.c.bf16 %v432_v50, %v431_v53  ;;  %v425_v57 = vmax.f32 %v411_v54, 0.0 }
 0x1d7   :  { %v434_v58 = vmin.f32 %v426_v55, 6.0 }
 0x1d8   :  { %v433_v59 = vmin.f32 %v425_v57, 6.0  ;;  %668 = vmatpush3.bf16.msra.mxu0 %v667_v56 }
 0x1d9   :  { %669 = vmatprep.subr.bf16.mxu0 %v704_v15 }
 0x1da   :  { %v670_v60 = vpack.c.bf16 %v434_v58, %v433_v59 }
 0x1dc   :  { %671 = vmatpush3.bf16.msra.mxu0 %v670_v60 }
 0x1df   :  { %642 = vmatmul.mubr.msk.f32.vlgmr.msra.gmra.mrb[8].mxu0 %vm289_vm1, %v435_v61 }
 0x2b2   :  { %v511_v63 = vpop.f32.mrb[8].mxu0 }
 0x2b3   :  { %v512_v0 = vadd.f32 %v511_v63, %v440_v62  ;;  %v643_v1 = vpop.f32.mrb[9].mxu0 }
 0x2b5   :  { %516 = vst.msk [vmem:[#allocation2] sm:$0xf] %vm515_vm3, %v512_v0 }
 0x2b6   :  { %690 = shalt.err (!%p687_p4)
}
 0x2b7   :  { %s691_s19 = scalar_lea.hbm %s891_s7, 64 }
 0x2b8   :  { %p692_p5 = scmp.ne.s32.totalorder %s891_s7, %s691_s19  ;;  %p695_p6 = scmp.lt.u32.totalorder %s691_s19, %s891_s7 }
 0x2ba   :  { %p697_p7 = pnand %p695_p6, %p692_p5 }
 0x2bc   :  { %700 = shalt.err (!%p697_p7)
}
 0x2bd   :  { %526 = dma.vmem_to_hbm [thread:$0]  %s524_s16, 64, %s891_s7, [#allocation3]  }
 0x2be   :  { %701 = dma.done.wait [#allocation3], 64  }
 0x2bf   :  { %702 = vsyncadd [#allocation3], 4294967232 }
 0x2c0   :  { %530 = vsyncpa [#allocation3], 1 }

</bundles_post_ra>
